<compile_context>
chip_gen: v7x
topology: tpu7x:2x2x1
jax: 0.10.0
libtpu: 0.0.40
codegen_flags: <defaults>
</compile_context>

<pallas_src>
import jax
import jax.numpy as jnp
from jax.experimental import pallas as pl
from jax.experimental.pallas import tpu as pltpu


def _silu(v):
    return v * jax.nn.sigmoid(v)


# ---------------------------------------------------------------------------
# Pallas kernel: per-(batch, channel) scale of the feature map + SiLU.
# x is laid out (B*C, S): rows (batch*channel) on sublanes, spatial on lanes.
# ---------------------------------------------------------------------------
def scale_silu_kernel(c_ref, x_ref, o_ref):
    # c_ref : (ROWS, 1)    per-row scale, resident across spatial tiles (same block index)
    # x_ref : (ROWS, TILE) lane-dense spatial tile
    # o_ref : (ROWS, TILE)
    y = x_ref[...] * c_ref[...]              # broadcast along the lane axis (cheap splat)
    o_ref[...] = _silu(y).astype(o_ref.dtype)


def _pick_block_shape(n_rows, s_pad, itemsize, target_bytes=2 * 1024 * 1024,
                      max_tile=16384):
    """Pick (ROWS, TILE): TILE a multiple of 128 dividing s_pad, ROWS a multiple of 8
    dividing n_rows (or the full row dim), targeting ~target_bytes per x block."""
    # Lane tile: largest multiple of 128 dividing s_pad, capped so an 8-row slab
    # stays near the byte target.
    tile_cap = min(s_pad, max_tile,
                   max(128, (target_bytes // (8 * itemsize)) // 128 * 128))
    tile = 128
    d = (tile_cap // 128) * 128
    while d >= 128:
        if s_pad % d == 0:
            tile = d
            break
        d -= 128

    # Row tile: multiple of 8 dividing n_rows, or the full row dim if that's impossible.
    if n_rows < 8 or n_rows % 8 != 0:
        rows = n_rows                         # full dim is allowed by the (8,128) rule
    else:
        rows_cap = max(8, (target_bytes // (tile * itemsize)) // 8 * 8)
        rows = 8
        r = (min(n_rows, rows_cap) // 8) * 8
        while r >= 8:
            if n_rows % r == 0:
                rows = r
                break
            r -= 8
    return rows, tile


def time_mlp_forward(x_nchw, t, w1, b1, w2, b2):
    """x_nchw: (B, C, Hs, Ws), t: (B, E). Returns SiLU(x * rms_norm(MLP(t)+1))."""
    B, C, Hs, Ws = x_nchw.shape
    assert w2.shape[1] == C, "MLP out_dim must equal the channel count of x"

    # ---- step 1: timestep MLP + RMS norm, left to XLA (tiny; fuses; no extra launch) ----
    h = _silu(t.astype(jnp.float32) @ w1 + b1)
    c = h @ w2 + b2 + 1.0
    c = c * jax.lax.rsqrt(jnp.mean(c * c, axis=1, keepdims=True) + 1e-8)
    c_col = c.reshape(B * C, 1).astype(x_nchw.dtype)   # matches PyTorch c.to(x.dtype)

    # ---- step 2: Pallas scale + SiLU over the feature map, lane-dense (B*C, S) view ----
    n_rows = B * C
    S = Hs * Ws
    x_flat = x_nchw.reshape(n_rows, S)        # free view of contiguous NCHW

    # Keep the lane axis a multiple of 128 (unmasked full-tile loads/stores).
    S_pad = ((S + 127) // 128) * 128
    padded = S_pad != S
    if padded:
        x_flat = jnp.pad(x_flat, ((0, 0), (0, S_pad - S)))

    itemsize = jnp.dtype(x_nchw.dtype).itemsize
    ROWS, TILE = _pick_block_shape(n_rows, S_pad, itemsize)

    out_flat = pl.pallas_call(
        scale_silu_kernel,
        out_shape=jax.ShapeDtypeStruct((n_rows, S_pad), x_nchw.dtype),
        grid=(n_rows // ROWS, S_pad // TILE),
        in_specs=[
            pl.BlockSpec((ROWS, 1), lambda r, s: (r, 0)),        # c column, resident over s
            pl.BlockSpec((ROWS, TILE), lambda r, s: (r, s)),     # x tile
        ],
        out_specs=pl.BlockSpec((ROWS, TILE), lambda r, s: (r, s)),
        compiler_params=pltpu.CompilerParams(
            dimension_semantics=("parallel", "parallel")),
    )(c_col, x_flat)

    if padded:
        out_flat = out_flat[:, :S]
    return out_flat.reshape(B, C, Hs, Ws)     # free view back to NCHW


def _reference(x, t, w1, b1, w2, b2):
    """Pure-JAX reference matching the PyTorch forward exactly."""
    h = _silu(t @ w1 + b1)
    c = h @ w2 + b2 + 1.0
    c = c / jnp.sqrt(jnp.mean(c * c, axis=1, keepdims=True) + 1e-8)
    y = x * c[:, :, None, None].astype(x.dtype)
    return _silu(y)


if __name__ == "__main__":
    key = jax.random.PRNGKey(0)
    B, C, Hs, Ws = 2, 4, 16, 16       # x: (batch, out_dim channels, H, W)
    E, Hd = 8, 32                      # embedding_dim, hidden_dim

    k = jax.random.split(key, 6)
    x = jax.random.normal(k[0], (B, C, Hs, Ws), jnp.float32)
    t = jax.random.normal(k[1], (B, E), jnp.float32)

    # Deterministic params, PyTorch nn.Linear-style uniform(-1/sqrt(fan_in), ...)
    bound1 = 1.0 / (E ** 0.5)
    w1 = jax.random.uniform(k[2], (E, Hd), jnp.float32, -bound1, bound1)
    b1 = jax.random.uniform(k[3], (Hd,), jnp.float32, -bound1, bound1)
    bound2 = 1.0 / (Hd ** 0.5)
    w2 = jax.random.uniform(k[4], (Hd, C), jnp.float32, -bound2, bound2)
    b2 = jax.random.uniform(k[5], (C,), jnp.float32, -bound2, bound2)

    out = jax.block_until_ready(time_mlp_forward(x, t, w1, b1, w2, b2))

    ref = _reference(x, t, w1, b1, w2, b2)
    assert out.shape == (B, C, Hs, Ws)
    assert jnp.allclose(out, ref, atol=1e-5, rtol=1e-5), "kernel/reference mismatch"

    print("KERNEL_OK")
</pallas_src>

<mosaic_0001>
module attributes {stable_mosaic.version = 11 : i64} {
  func.func @scale_silu_kernel(%arg0: i32, %arg1: i32, %arg2: memref<8x1xf32, #tpu.memory_space<vmem>>, %arg3: memref<8x256xf32, #tpu.memory_space<vmem>>, %arg4: memref<8x256xf32, #tpu.memory_space<vmem>>) attributes {dimension_semantics = [#tpu.dimension_semantics<parallel>, #tpu.dimension_semantics<parallel>], iteration_bounds = array<i64: 1, 1>, scalar_prefetch = 0 : i64, scratch_operands = 0 : i64, tpu.core_type = #tpu.core_type<tc>, window_params = [{transform_indices = @transform_0, window_bounds = array<i64: 8, 1>}, {transform_indices = @transform_1, window_bounds = array<i64: 8, 256>}, {transform_indices = @transform_2, window_bounds = array<i64: 8, 256>}]} {
    %c0 = arith.constant 0 : index
    %c0_0 = arith.constant 0 : index
    %0 = vector.load %arg3[%c0, %c0_0] : memref<8x256xf32, #tpu.memory_space<vmem>>, vector<8x256xf32>
    %c0_1 = arith.constant 0 : index
    %c0_2 = arith.constant 0 : index
    %1 = vector.load %arg2[%c0_1, %c0_2] : memref<8x1xf32, #tpu.memory_space<vmem>>, vector<8x1xf32>
    %2 = vector.broadcast %1 : vector<8x1xf32> to vector<8x256xf32>
    %3 = arith.mulf %0, %2 : vector<8x256xf32>
    %4 = arith.negf %3 : vector<8x256xf32>
    %5 = math.exp %4 : vector<8x256xf32>
    %cst = arith.constant 1.000000e+00 : f32
    %6 = vector.broadcast %cst : f32 to vector<8x256xf32>
    %7 = arith.addf %6, %5 : vector<8x256xf32>
    %8 = arith.divf %6, %7 : vector<8x256xf32>
    %9 = arith.mulf %3, %8 : vector<8x256xf32>
    %c0_3 = arith.constant 0 : index
    %c0_4 = arith.constant 0 : index
    %10 = vector.load %arg4[%c0_3, %c0_4] : memref<8x256xf32, #tpu.memory_space<vmem>>, vector<8x256xf32>
    tpu.vector_store %arg4[%c0_3, %c0_4], %9 {strides = array<i32>} : memref<8x256xf32, #tpu.memory_space<vmem>>, vector<8x256xf32>,
    return
  }
  func.func @transform_0(%arg0: i32, %arg1: i32) -> (i32, i32) {
    %c0_i32 = arith.constant 0 : i32
    %c0_i32_0 = arith.constant 0 : i32
    return %arg0, %c0_i32 : i32, i32
  }
  func.func @transform_1(%arg0: i32, %arg1: i32) -> (i32, i32) {
    %c0_i32 = arith.constant 0 : i32
    return %arg0, %arg1 : i32, i32
  }
  func.func @transform_2(%arg0: i32, %arg1: i32) -> (i32, i32) {
    %c0_i32 = arith.constant 0 : i32
    return %arg0, %arg1 : i32, i32
  }
}

</mosaic_0001>

<bundles_post_ra>
// kernel: tpu_custom_call.1
= control target key start
LH: loop header
LB: loop body
LE: loop exit
PB: predicated region body
PF: predicated region fallthrough
CT: control target
= control target key end

     0   :  { %7 = vsyncpa [#allocation3], 0  ;;  %s172_s0 = inlined_call_operand.vmem [shape: f32[8,1], index: 0, kind: input, shape index: {}]   ;;  %s173_s1 = inlined_call_operand.hbm [shape: f32[8,256], index: 1, kind: input, shape index: {}]   ;;  %s174_s2 = inlined_call_operand.hbm [shape: f32[8,256], index: 2, kind: output, shape index: {}]  }
   0x1   :  { %8 = vsyncpa [#allocation4], 0  ;;  %s127_s9 = smov [#allocation2]   ;;  %s79_s13 = scalar_lea.hbm %s173_s1, 256 }
   0x2   :  { %s17_s10 = sshll.u32 %s127_s9, 4  ;;  %p80_p0 = scmp.ne.s32.totalorder %s173_s1, %s79_s13  ;;  %s18_s10 = int_to_ptr.vmem [resolvable:$true] %s17_s10 }
   0x3   :  { %p83_p1 = scmp.lt.u32.totalorder %s79_s13, %s173_s1 }
   0x5   :  { %p85_p2 = pnand %p83_p1, %p80_p0 }
   0x7   :  { %88 = shalt.err (!%p85_p2)
}
   0x8   :  { %s89_s18 = scalar_lea.vmem %s18_s10, 256  ;;  %p94_p4 = scmp.lt.s32.totalorder %s18_s10, %s18_s10 }
   0x9   :  { %p90_p3 = scmp.ne.s32.totalorder %s18_s10, %s89_s18  ;;  %p95_p5 = scmp.lt.s32.totalorder %s89_s18, %s89_s18 }
   0xb   :  { %p96_p6 = por %p95_p5, %p94_p4 }
   0xd   :  { %p97_p7 = pnand %p96_p6, %p90_p3 }
   0xf   :  { %100 = shalt.err (!%p97_p7)
}
  0x10   :  { %20 = dma.hbm_to_vmem [thread:$0]  %s173_s1, 256, %s18_s10, [#allocation3]  }
  0x11   :  { %123 = dma.done.wait [#allocation3], 256  }
  0x12   :  { %124 = vsyncadd [#allocation3], 4294967040  ;;  %v128_v0 = vmov 0   ;;  %v26_v1 = vld [vmem:[%s172_s0] sm:$0xff]  ;;  %v25_v3 = vld [vmem:[#allocation2 + $0x8] sm:$0xff]  ;;  %s129_s1 = smov [#allocation5]  }
  0x13   :  { %70 = vset.pattern.permute.xlu0 %v128_v0  ;;  %v24_v2 = vld [vmem:[#allocation2] sm:$0xff]  ;;  %s56_s23 = sshll.u32 %s129_s1, 4  ;;  %s57_s23 = int_to_ptr.vmem [resolvable:$true] %s56_s23 }
  0x14   :  { %29 = vperm.xlu0 %70, %v26_v1   ;;  %s101_s0 = scalar_lea.vmem %s57_s23, 256  ;;  %p106_p9 = scmp.lt.s32.totalorder %s57_s23, %s57_s23 }
  0x15   :  { %p102_p8 = scmp.ne.s32.totalorder %s57_s23, %s101_s0  ;;  %p107_p10 = scmp.lt.s32.totalorder %s101_s0, %s101_s0 }
  0x17   :  { %p108_p11 = por %p107_p10, %p106_p9 }
  0x19   :  { %p109_p12 = pnand %p108_p11, %p102_p8 }
  0x93   :  { %v30_v4 = vpop.permute.xlu0 %29 }
  0x94   :  { %v32_v5 = vmul.f32 %v30_v4, %v24_v2  ;;  %v33_v6 = vmul.f32 %v30_v4, %v25_v3 }
  0x96   :  { %v65_v7 = vmul.f32 -1.442695, %v32_v5  ;;  %v66_v8 = vmul.f32 -1.442695, %v33_v6 }
  0x98   :  { %71 = vpow2.f32 %v65_v7 }
  0x99   :  { %73 = vpow2.f32 %v66_v8 }
  0xa2   :  { %v72_v9 = vpop.eup %71 }
  0xa3   :  { %v74_v10 = vpop.eup %73  ;;  %v40_v11 = vadd.f32 1.0, %v72_v9 }
  0xa4   :  { %v41_v12 = vadd.f32 1.0, %v74_v10 }
  0xa5   :  { %75 = vrcp.f32 %v40_v11 }
  0xa6   :  { %77 = vrcp.f32 %v41_v12 }
  0xaf   :  { %v76_v13 = vpop.eup %75 }
  0xb0   :  { %v78_v14 = vpop.eup %77  ;;  %v46_v15 = vmul.f32 %v76_v13, %v32_v5 }
  0xb1   :  { %v47_v16 = vmul.f32 %v78_v14, %v33_v6 }
  0xb2   :  { %48 = vst [vmem:[#allocation5] sm:$0xff] %v46_v15 }
  0xb3   :  { %49 = vst [vmem:[#allocation5 + $0x8] sm:$0xff] %v47_v16 }
  0xb4   :  { %112 = shalt.err (!%p109_p12)
}
  0xb5   :  { %s113_s26 = scalar_lea.hbm %s174_s2, 256 }
  0xb6   :  { %p114_p13 = scmp.ne.s32.totalorder %s174_s2, %s113_s26  ;;  %p117_p0 = scmp.lt.u32.totalorder %s113_s26, %s174_s2 }
  0xb8   :  { %p119_p1 = pnand %p117_p0, %p114_p13 }
  0xba   :  { %122 = shalt.err (!%p119_p1)
}
  0xbb   :  { %59 = dma.vmem_to_hbm [thread:$0]  %s57_s23, 256, %s174_s2, [#allocation4]  }
  0xbc   :  { %125 = dma.done.wait [#allocation4], 256  }
  0xbd   :  { %126 = vsyncadd [#allocation4], 4294967040 }
  0xbe   :  { %63 = vsyncpa [#allocation3], 1 }
  0xbf   :  { %64 = vsyncpa [#allocation4], 1 }

</bundles_post_ra>
